<compile_context>
chip_gen: v7x
topology: tpu7x:2x2x1
jax: 0.10.0
libtpu: 0.0.40
codegen_flags: <defaults>
</compile_context>

<pallas_src>
import jax
import jax.numpy as jnp
from jax.experimental import pallas as pl
from jax.experimental.pallas import tpu as pltpu


LANE = 128      # lane width (last-dim alignment)
SUBLANE = 16    # sublane multiple safe for bf16 second-to-last dims


def _round_up(v, m):
    return ((v + m - 1) // m) * m


def _pad_to(a, shape):
    pads = [(0, s - d) for d, s in zip(a.shape, shape)]
    if all(p == (0, 0) for p in pads):
        return a
    return jnp.pad(a, pads)


def _vmem_ceiling_bytes():
    """~85% of this generation's physical VMEM (headroom for compiler scratch)."""
    try:
        cap = int(pltpu.get_tpu_info().vmem_capacity_bytes)
    except Exception:
        # Narrow fallback only for the hardware query (not for kernel builds):
        # assume the smallest current part (v7x: 64 MiB per TensorCore).
        cap = 64 * 1024 * 1024
    return int(0.85 * cap)


def _choose_block_n(d_out_p, requested):
    """Output-column tile: keep >= 256 where possible, minimizing zero padding."""
    requested = _round_up(max(LANE, min(requested, d_out_p)), LANE)
    if d_out_p <= requested:
        return d_out_p                       # single tile, no extra padding
    cands = sorted({c for c in (256, 384, 512, requested)
                    if LANE <= c <= requested and c % LANE == 0})
    # Minimize padded output width; prefer the wider tile on ties.
    return min(cands, key=lambda c: (_round_up(d_out_p, c), -c))


def _choose_block_k(d_in_p, d_h_p, item_bytes, requested, vmem_ceiling):
    """D_in (reduction) tile for the first GEMM; W1 stays resident if it fits."""
    if requested is not None:
        return _round_up(max(LANE, min(requested, d_in_p)), LANE)
    w1_budget = int(0.35 * vmem_ceiling)     # VMEM share for W1's double buffer
    if 2 * d_in_p * d_h_p * item_bytes <= w1_budget:
        return d_in_p                        # fully resident W1
    bk = (w1_budget // (2 * d_h_p * item_bytes)) // LANE * LANE
    return max(LANE, min(d_in_p, int(bk)))


def _make_mlp_kernel(num_k, num_n, compute_dtype):
    """Kernel over grid (batch_tile, phase).

    Phases p in [0, num_k-1] accumulate the hidden activation over D_in tiles;
    phases p in [num_k-1, num_k+num_n-2] stream W2 column tiles through the
    second GEMM (the boundary phase does both, so no grid step is wasted).
    """
    last_k = num_k - 1

    def kernel(x_ref, w1_ref, b1_ref, w2_ref, b2_ref, o_ref, *scratch):
        si = 0
        h_acc = None
        h_cache = None
        if num_k > 1:
            h_acc = scratch[si]
            si += 1
        if num_n > 1:
            h_cache = scratch[si]

        def partial_h():
            # bf16 x bf16 -> f32 on the MXU.
            return jnp.dot(x_ref[...], w1_ref[...],
                           preferred_element_type=jnp.float32)

        def bias_relu(h32):
            return jnp.maximum(h32 + b1_ref[...], 0.0)   # f32 epilogue (VPU)

        def write_out(h_c):
            y = jnp.dot(h_c, w2_ref[...], preferred_element_type=jnp.float32)
            o_ref[...] = (y + b2_ref[...]).astype(o_ref.dtype)

        if num_k == 1 and num_n == 1:
            # Everything resident: no scratch, no hidden round trip.
            write_out(bias_relu(partial_h()).astype(compute_dtype))
            return

        p = pl.program_id(1)

        if num_k == 1:
            # W1 resident: compute h once per batch tile, cache it in VMEM and
            # reuse it for every output-column tile (N axis is sequential).
            @pl.when(p == 0)
            def _():
                h_cache[...] = bias_relu(partial_h()).astype(h_cache.dtype)

            write_out(h_cache[...])
            return

        # K-tiled first GEMM: accumulate the hidden activation in f32.
        @pl.when(p == 0)
        def _():
            h_acc[...] = jnp.zeros_like(h_acc)

        @pl.when(p < num_k)
        def _():
            h_acc[...] += partial_h()

        if num_n == 1:
            @pl.when(p == last_k)
            def _():
                write_out(bias_relu(h_acc[...]).astype(compute_dtype))
        else:
            @pl.when(p == last_k)
            def _():
                h_cache[...] = bias_relu(h_acc[...]).astype(h_cache.dtype)

            @pl.when(p >= last_k)
            def _():
                write_out(h_cache[...])

    return kernel


def mlp_forward(x, w1, b1, w2, b2, *, block_b=512, block_n=512, block_k=None,
                compute_dtype=jnp.bfloat16):
    """x: [B, D_in]; w1: [D_in, D_h]; b1: [D_h]; w2: [D_h, D_out]; b2: [D_out]."""
    B, D_in = x.shape
    D_h = w1.shape[1]
    D_out = w2.shape[1]
    out_dtype = x.dtype
    c_item = jnp.dtype(compute_dtype).itemsize
    o_item = jnp.dtype(out_dtype).itemsize

    ceiling = _vmem_ceiling_bytes()

    # ---- lane-dense / MXU-aligned padded dims (zero padding is exact) ----
    D_in_p = _round_up(D_in, LANE)
    D_h_p = _round_up(D_h, LANE)
    D_out_p = _round_up(D_out, LANE)

    block_n = _choose_block_n(D_out_p, block_n)
    D_out_p = _round_up(D_out_p, block_n)
    num_n = D_out_p // block_n

    block_k = _choose_block_k(D_in_p, D_h_p, c_item, block_k, ceiling)
    D_in_p = _round_up(D_in_p, block_k)
    num_k = D_in_p // block_k

    # ---- batch tile: big by default; split so v7x megacore sees >= 2 tiles ----
    block_b = _round_up(max(SUBLANE, min(block_b, _round_up(B, SUBLANE))),
                        SUBLANE)
    if _round_up(B, block_b) // block_b < 2:
        half = _round_up(max(SUBLANE, block_b // 2), SUBLANE)
        if half < block_b and _round_up(B, half) // half >= 2:
            block_b = half

    def vmem_bytes(bb):
        return (2 * bb * block_k * c_item              # x (double buffered)
                + 2 * block_k * D_h_p * c_item         # W1
                + 2 * D_h_p * 4                        # b1 (f32)
                + 2 * D_h_p * block_n * c_item         # W2
                + 2 * block_n * 4                      # b2 (f32)
                + 2 * bb * block_n * o_item            # out
                + (bb * D_h_p * 4 if num_k > 1 else 0)          # f32 h acc
                + (bb * D_h_p * c_item if num_n > 1 else 0))    # bf16 h cache

    while vmem_bytes(block_b) > ceiling and block_b > SUBLANE:
        block_b = _round_up(max(SUBLANE, block_b // 2), SUBLANE)

    B_p = _round_up(B, block_b)
    num_b = B_p // block_b

    # ---- pad + cast operands ----
    x_p = _pad_to(x, (B_p, D_in_p)).astype(compute_dtype)
    w1_p = _pad_to(w1, (D_in_p, D_h_p)).astype(compute_dtype)
    w2_p = _pad_to(w2, (D_h_p, D_out_p)).astype(compute_dtype)
    b1_p = _pad_to(b1.reshape(1, D_h), (1, D_h_p)).astype(jnp.float32)
    b2_p = _pad_to(b2.reshape(1, D_out), (1, D_out_p)).astype(jnp.float32)

    vmem_limit = int(min(ceiling, max(32 * 1024 * 1024,
                                      int(1.5 * vmem_bytes(block_b)))))

    # HBM traffic: W1 is re-streamed per batch tile when K-tiled; W2/b2 are
    # re-streamed per batch tile when N-tiled (constant index_map otherwise).
    cost = pl.CostEstimate(
        flops=2 * B_p * D_in_p * D_h_p + 2 * B_p * D_h_p * D_out_p,
        transcendentals=0,
        bytes_accessed=(x_p.size * c_item
                        + w1_p.size * c_item * (num_b if num_k > 1 else 1)
                        + b1_p.size * 4
                        + (w2_p.size * c_item + b2_p.size * 4)
                        * (num_b if num_n > 1 else 1)
                        + B_p * D_out_p * o_item),
    )

    last_k = num_k - 1
    grid = (num_b, num_k + num_n - 1)

    in_specs = [
        pl.BlockSpec((block_b, block_k),
                     lambda i, p: (i, jnp.minimum(p, last_k))),        # x
        pl.BlockSpec((block_k, D_h_p),
                     lambda i, p: (jnp.minimum(p, last_k), 0)),        # W1
        pl.BlockSpec((1, D_h_p), lambda i, p: (0, 0)),                 # b1
        pl.BlockSpec((D_h_p, block_n),
                     lambda i, p: (0, jnp.maximum(p - last_k, 0))),    # W2
        pl.BlockSpec((1, block_n),
                     lambda i, p: (0, jnp.maximum(p - last_k, 0))),    # b2
    ]
    out_specs = pl.BlockSpec((block_b, block_n),
                             lambda i, p: (i, jnp.maximum(p - last_k, 0)))

    scratch_shapes = []
    if num_k > 1:
        scratch_shapes.append(pltpu.VMEM((block_b, D_h_p), jnp.float32))
    if num_n > 1:
        scratch_shapes.append(pltpu.VMEM((block_b, D_h_p), compute_dtype))

    out_p = pl.pallas_call(
        _make_mlp_kernel(num_k, num_n, compute_dtype),
        out_shape=jax.ShapeDtypeStruct((B_p, D_out_p), out_dtype),
        grid_spec=pltpu.PrefetchScalarGridSpec(
            num_scalar_prefetch=0,
            grid=grid,
            in_specs=in_specs,
            out_specs=out_specs,
            scratch_shapes=tuple(scratch_shapes),
        ),
        compiler_params=pltpu.CompilerParams(
            dimension_semantics=("parallel", "arbitrary"),
            vmem_limit_bytes=vmem_limit),
        cost_estimate=cost,
    )(x_p, w1_p, b1_p, w2_p, b2_p)

    return out_p[:B, :D_out]


if __name__ == "__main__":
    key = jax.random.PRNGKey(0)

    def make_params(k, d_in, d_out):
        kw1, kb1, kw2, kb2 = jax.random.split(k, 4)
        # PyTorch Linear stores weight as [out, in]; transpose to [in, out].
        w1 = (jax.random.normal(kw1, (d_out, d_in), jnp.float32) * 0.1).T
        b1 = jax.random.normal(kb1, (d_out,), jnp.float32) * 0.1
        w2 = (jax.random.normal(kw2, (d_out, d_out), jnp.float32) * 0.1).T
        b2 = jax.random.normal(kb2, (d_out,), jnp.float32) * 0.1
        return w1, b1, w2, b2

    def ref_mlp(x, w1, b1, w2, b2):
        # Reference matching the kernel's bf16-in / f32-accumulate numerics.
        bf = lambda a: a.astype(jnp.bfloat16).astype(jnp.float32)
        h = jnp.maximum(bf(x) @ bf(w1) + b1, 0.0)
        return bf(h) @ bf(w2) + b2

    def check(out, x, params, atol, rtol):
        ref = ref_mlp(x, *params)
        assert out.shape == ref.shape, (out.shape, ref.shape)
        assert jnp.allclose(out, ref, atol=atol, rtol=rtol), float(
            jnp.max(jnp.abs(out - ref)))

    # 1) Tiny shapes: everything resident (num_k == num_n == 1, no scratch).
    B, D_in, D_out = 8, 16, 32
    kx, kp, key = jax.random.split(key, 3)
    x = jax.random.normal(kx, (B, D_in), jnp.float32)
    params = make_params(kp, D_in, D_out)
    out = jax.block_until_ready(mlp_forward(x, *params))
    check(out, x, params, 2e-2, 2e-2)

    # 2) Ragged batch + awkward D_out: block_n stays >= 256 (padded D_out),
    #    batch split into >= 2 "parallel" tiles, hidden cached across N tiles.
    B, D_in, D_out = 300, 200, 640
    kx, kp, key = jax.random.split(key, 3)
    x = jax.random.normal(kx, (B, D_in), jnp.float32)
    params = make_params(kp, D_in, D_out)
    out = jax.block_until_ready(mlp_forward(x, *params))
    check(out, x, params, 5e-2, 5e-2)

    # 3) K-tiled first GEMM (forced small block_k), single output-column tile.
    B, D_in, D_out = 64, 384, 256
    kx, kp, key = jax.random.split(key, 3)
    x = jax.random.normal(kx, (B, D_in), jnp.float32)
    params = make_params(kp, D_in, D_out)
    out = jax.block_until_ready(mlp_forward(x, *params, block_k=128))
    check(out, x, params, 5e-2, 5e-2)

    # 4) K-tiled + N-tiled (full phase pipeline).
    B, D_in, D_out = 64, 384, 640
    kx, kp, key = jax.random.split(key, 3)
    x = jax.random.normal(kx, (B, D_in), jnp.float32)
    params = make_params(kp, D_in, D_out)
    out = jax.block_until_ready(
        mlp_forward(x, *params, block_k=128, block_n=256))
    check(out, x, params, 5e-2, 5e-2)

    print("KERNEL_OK")
</pallas_src>

<mosaic_0001>
module attributes {stable_mosaic.version = 11 : i64} {
  func.func @kernel(%arg0: i32, %arg1: i32, %arg2: memref<16x128xbf16, #tpu.memory_space<vmem>>, %arg3: memref<128x128xbf16, #tpu.memory_space<vmem>>, %arg4: memref<1x128xf32, #tpu.memory_space<vmem>>, %arg5: memref<128x128xbf16, #tpu.memory_space<vmem>>, %arg6: memref<1x128xf32, #tpu.memory_space<vmem>>, %arg7: memref<16x128xf32, #tpu.memory_space<vmem>>) attributes {dimension_semantics = [#tpu.dimension_semantics<parallel>, #tpu.dimension_semantics<arbitrary>], iteration_bounds = array<i64: 1, 1>, scalar_prefetch = 0 : i64, scratch_operands = 0 : i64, tpu.core_type = #tpu.core_type<tc>, window_params = [{transform_indices = @transform_0, window_bounds = array<i64: 16, 128>}, {transform_indices = @transform_1, window_bounds = array<i64: 128, 128>}, {pipeline_mode = #tpu.pipeline_mode<synchronous>, transform_indices = @transform_2, window_bounds = array<i64: 1, 128>}, {transform_indices = @transform_3, window_bounds = array<i64: 128, 128>}, {transform_indices = @transform_4, window_bounds = array<i64: 1, 128>}, {transform_indices = @transform_5, window_bounds = array<i64: 16, 128>}]} {
    %c0 = arith.constant 0 : index
    %c0_0 = arith.constant 0 : index
    %0 = vector.load %arg2[%c0, %c0_0] : memref<16x128xbf16, #tpu.memory_space<vmem>>, vector<16x128xbf16>
    %c0_1 = arith.constant 0 : index
    %c0_2 = arith.constant 0 : index
    %1 = vector.load %arg3[%c0_1, %c0_2] : memref<128x128xbf16, #tpu.memory_space<vmem>>, vector<128x128xbf16>
    %cst = arith.constant dense<0.000000e+00> : vector<16x128xf32>
    %2 = tpu.matmul %0, %1, %cst {dimension_numbers = #tpu.dot_dimension_numbers<[1], [0], [0], [1], [0, 0, 1, 1], [], []>} : vector<16x128xbf16>, vector<128x128xbf16>, vector<16x128xf32> -> vector<16x128xf32>
    %c0_3 = arith.constant 0 : index
    %c0_4 = arith.constant 0 : index
    %3 = vector.load %arg4[%c0_3, %c0_4] : memref<1x128xf32, #tpu.memory_space<vmem>>, vector<1x128xf32>
    %4 = vector.broadcast %3 : vector<1x128xf32> to vector<16x128xf32>
    %5 = arith.addf %2, %4 : vector<16x128xf32>
    %cst_5 = arith.constant 0.000000e+00 : f32
    %6 = vector.broadcast %cst_5 : f32 to vector<16x128xf32>
    %7 = arith.maximumf %5, %6 : vector<16x128xf32>
    %8 = arith.truncf %7 : vector<16x128xf32> to vector<16x128xbf16>
    %c0_6 = arith.constant 0 : index
    %c0_7 = arith.constant 0 : index
    %9 = vector.load %arg5[%c0_6, %c0_7] : memref<128x128xbf16, #tpu.memory_space<vmem>>, vector<128x128xbf16>
    %cst_8 = arith.constant dense<0.000000e+00> : vector<16x128xf32>
    %10 = tpu.matmul %8, %9, %cst_8 {dimension_numbers = #tpu.dot_dimension_numbers<[1], [0], [0], [1], [0, 0, 1, 1], [], []>} : vector<16x128xbf16>, vector<128x128xbf16>, vector<16x128xf32> -> vector<16x128xf32>
    %c0_9 = arith.constant 0 : index
    %c0_10 = arith.constant 0 : index
    %11 = vector.load %arg6[%c0_9, %c0_10] : memref<1x128xf32, #tpu.memory_space<vmem>>, vector<1x128xf32>
    %12 = vector.broadcast %11 : vector<1x128xf32> to vector<16x128xf32>
    %13 = arith.addf %10, %12 : vector<16x128xf32>
    %c0_11 = arith.constant 0 : index
    %c0_12 = arith.constant 0 : index
    %14 = vector.load %arg7[%c0_11, %c0_12] : memref<16x128xf32, #tpu.memory_space<vmem>>, vector<16x128xf32>
    tpu.vector_store %arg7[%c0_11, %c0_12], %13 {strides = array<i32>} : memref<16x128xf32, #tpu.memory_space<vmem>>, vector<16x128xf32>,
    return
  }
  func.func @transform_0(%arg0: i32, %arg1: i32) -> (i32, i32) {
    %c0_i32 = arith.constant 0 : i32
    %0 = arith.minsi %arg1, %c0_i32 : i32
    %c0_i32_0 = arith.constant 0 : i32
    return %arg0, %0 : i32, i32
  }
  func.func @transform_1(%arg0: i32, %arg1: i32) -> (i32, i32) {
    %c0_i32 = arith.constant 0 : i32
    %0 = arith.minsi %arg1, %c0_i32 : i32
    %c0_i32_0 = arith.constant 0 : i32
    %c0_i32_1 = arith.constant 0 : i32
    return %0, %c0_i32_0 : i32, i32
  }
  func.func @transform_2(%arg0: i32, %arg1: i32) -> (i32, i32) {
    %c0_i32 = arith.constant 0 : i32
    %c0_i32_0 = arith.constant 0 : i32
    %c0_i32_1 = arith.constant 0 : i32
    return %c0_i32, %c0_i32_0 : i32, i32
  }
  func.func @transform_3(%arg0: i32, %arg1: i32) -> (i32, i32) {
    %c0_i32 = arith.constant 0 : i32
    %0 = arith.subi %arg1, %c0_i32 : i32
    %c0_i32_0 = arith.constant 0 : i32
    %1 = arith.maxsi %0, %c0_i32_0 : i32
    %c0_i32_1 = arith.constant 0 : i32
    %c0_i32_2 = arith.constant 0 : i32
    return %c0_i32_1, %1 : i32, i32
  }
  func.func @transform_4(%arg0: i32, %arg1: i32) -> (i32, i32) {
    %c0_i32 = arith.constant 0 : i32
    %0 = arith.subi %arg1, %c0_i32 : i32
    %c0_i32_0 = arith.constant 0 : i32
    %1 = arith.maxsi %0, %c0_i32_0 : i32
    %c0_i32_1 = arith.constant 0 : i32
    %c0_i32_2 = arith.constant 0 : i32
    return %c0_i32_1, %1 : i32, i32
  }
  func.func @transform_5(%arg0: i32, %arg1: i32) -> (i32, i32) {
    %c0_i32 = arith.constant 0 : i32
    %0 = arith.subi %arg1, %c0_i32 : i32
    %c0_i32_0 = arith.constant 0 : i32
    %1 = arith.maxsi %0, %c0_i32_0 : i32
    %c0_i32_1 = arith.constant 0 : i32
    return %arg0, %1 : i32, i32
  }
}

</mosaic_0001>

<bundles_post_ra>
// kernel: tpu_custom_call.1
= control target key start
LH: loop header
LB: loop body
LE: loop exit
PB: predicated region body
PF: predicated region fallthrough
CT: control target
= control target key end

     0   :  { %10 = vsyncpa [#allocation3], 0  ;;  %s626_s0 = inlined_call_operand.hbm [shape: bf16[16,128], index: 0, kind: input, shape index: {}]   ;;  %s627_s1 = inlined_call_operand.hbm [shape: bf16[128,128], index: 1, kind: input, shape index: {}]   ;;  %s628_s2 = inlined_call_operand.vmem [shape: f32[1,128], index: 2, kind: input, shape index: {}]   ;;  %s629_s3 = inlined_call_operand.hbm [shape: bf16[128,128], index: 3, kind: input, shape index: {}]   ;;  %s630_s4 = inlined_call_operand.vmem [shape: f32[1,128], index: 4, kind: input, shape index: {}]   ;;  %s631_s5 = inlined_call_operand.hbm [shape: f32[16,128], index: 5, kind: output, shape index: {}]  }
   0x1   :  { %11 = vsyncpa [#allocation6], 0 }
   0x2   :  { %12 = vsyncpa [#allocation4], 0  ;;  %s516_s18 = smov [#allocation5]   ;;  %s517_s20 = smov [#allocation2]  }
   0x3   :  { %s30_s19 = sshll.u32 %s516_s18, 4  ;;  %s18_s21 = sshll.u32 %s517_s20, 4  ;;  %s31_s19 = int_to_ptr.vmem [resolvable:$true] %s30_s19  ;;  %s556_s21 = int_to_ptr.vmem [resolvable:$true] %s18_s21 }
   0x4   :  { %s422_s24 = scalar_lea.hbm %s627_s1, 1024 }
   0x5   :  { %p423_p0 = scmp.ne.s32.totalorder %s627_s1, %s422_s24  ;;  %p426_p1 = scmp.lt.u32.totalorder %s422_s24, %s627_s1 }
   0x7   :  { %p428_p2 = pnand %p426_p1, %p423_p0 }
   0x9   :  { %431 = shalt.err (!%p428_p2)
}
   0xa   :  { %s432_s29 = scalar_lea.vmem %s31_s19, 1024  ;;  %p437_p4 = scmp.lt.s32.totalorder %s31_s19, %s31_s19 }
   0xb   :  { %p433_p3 = scmp.ne.s32.totalorder %s31_s19, %s432_s29  ;;  %p438_p5 = scmp.lt.s32.totalorder %s432_s29, %s432_s29 }
   0xd   :  { %p439_p6 = por %p438_p5, %p437_p4 }
   0xf   :  { %p440_p7 = pnand %p439_p6, %p433_p3 }
  0x11   :  { %443 = shalt.err (!%p440_p7)
}
  0x12   :  { %s518_s30 = smov 64   ;;  %s519_s6 = smov 4  }
  0x13   :  { %36 = dma.hbm_to_vmem [thread:$0]  %s627_s1, 1024, %s31_s19, [#allocation6], %s518_s30, %s518_s30, %s519_s6  }
  0x14   :  { %s444_s11 = scalar_lea.hbm %s626_s0, 128 }
  0x15   :  { %p445_p8 = scmp.ne.s32.totalorder %s626_s0, %s444_s11  ;;  %p448_p9 = scmp.lt.u32.totalorder %s444_s11, %s626_s0 }
  0x17   :  { %p450_p10 = pnand %p448_p9, %p445_p8 }
  0x19   :  { %453 = shalt.err (!%p450_p10)
}
  0x1a   :  { %s454_s16 = scalar_lea.vmem %s556_s21, 128  ;;  %p459_p12 = scmp.lt.s32.totalorder %s556_s21, %s556_s21 }
  0x1b   :  { %p455_p11 = scmp.ne.s32.totalorder %s556_s21, %s454_s16  ;;  %p460_p13 = scmp.lt.s32.totalorder %s454_s16, %s454_s16 }
  0x1d   :  { %p461_p0 = por %p460_p13, %p459_p12 }
  0x1f   :  { %p462_p1 = pnand %p461_p0, %p455_p11 }
  0x21   :  { %465 = shalt.err (!%p462_p1)
}
  0x22   :  { %24 = dma.hbm_to_vmem [thread:$0]  %s626_s0, 128, %s556_s21, [#allocation3], %s518_s30, %s518_s30, %s519_s6  }
  0x23   :  { %s520_s18 = smov [#allocation7]   ;;  %s466_s23 = scalar_lea.hbm %s629_s3, 1024 }
  0x24   :  { %s44_s19 = sshll.u32 %s520_s18, 4  ;;  %p467_p2 = scmp.ne.s32.totalorder %s629_s3, %s466_s23  ;;  %s45_s19 = int_to_ptr.vmem [resolvable:$true] %s44_s19 }
  0x25   :  { %p470_p3 = scmp.lt.u32.totalorder %s466_s23, %s629_s3 }
  0x27   :  { %p472_p4 = pnand %p470_p3, %p467_p2 }
  0x29   :  { %475 = shalt.err (!%p472_p4)
}
  0x2a   :  { %s476_s28 = scalar_lea.vmem %s45_s19, 1024  ;;  %p481_p6 = scmp.lt.s32.totalorder %s45_s19, %s45_s19 }
  0x2b   :  { %p477_p5 = scmp.ne.s32.totalorder %s45_s19, %s476_s28  ;;  %p482_p7 = scmp.lt.s32.totalorder %s476_s28, %s476_s28 }
  0x2d   :  { %p483_p8 = por %p482_p7, %p481_p6 }
  0x2f   :  { %p484_p9 = pnand %p483_p8, %p477_p5 }
  0x31   :  { %487 = shalt.err (!%p484_p9)
}
  0x32   :  { %50 = dma.hbm_to_vmem [thread:$0]  %s629_s3, 1024, %s45_s19, [#allocation6], %s518_s30, %s518_s30, %s519_s6  }
  0x33   :  { %510 = dma.done.wait [#allocation3], 128  }
  0x34   :  { %511 = vsyncadd [#allocation3], 4294967168 }
  0x35   :  { %512 = dma.done.wait [#allocation6], 2048  }
  0x36   :  { %513 = vsyncadd [#allocation6], 4294965248  ;;  %v521_v0 = vmov 0.0   ;;  %vm522_vm0 = vmmov 0   ;;  %v405_v1 = vld [vmem:[#allocation5] sm:$0xff]   ;;  %v406_v2 = vld [vmem:[#allocation5 + $0x8] sm:$0xff]  }
  0x37   :  { %355 = vmatprep.subr.bf16.mxu0 %v521_v0  ;;  %371 = vmatprep.mubr.msk.bf16.mxu0 %vm522_vm0, %v521_v0  ;;  %v407_v3 = vld [vmem:[#allocation5 + $0x10] sm:$0xff]   ;;  %v414_v4 = vld [vmem:[#allocation7] sm:$0xff]   ;;  %v408_v5 = vld [vmem:[#allocation5 + $0x18] sm:$0xff]   ;;  %s523_s7 = smov [#allocation8]  }
  0x38   :  { %375 = vmatprep.subr.bf16.mxu1 %v521_v0  ;;  %391 = vmatprep.mubr.msk.bf16.mxu1 %vm522_vm0, %v521_v0  ;;  %v415_v6 = vld [vmem:[#allocation7 + $0x8] sm:$0xff]   ;;  %v409_v7 = vld [vmem:[#allocation5 + $0x20] sm:$0xff]   ;;  %v416_v8 = vld [vmem:[#allocation7 + $0x10] sm:$0xff]   ;;  %s305_s8 = sshll.u32 %s523_s7, 4  ;;  %s306_s8 = int_to_ptr.vmem [resolvable:$true] %s305_s8 }
  0x39   :  { %356 = vmatpush3.bf16.msra.mxu0 %v405_v1  ;;  %376 = vmatpush3.bf16.msra.mxu1 %v414_v4  ;;  %v410_v9 = vld [vmem:[#allocation5 + $0x28] sm:$0xff]   ;;  %v417_v10 = vld [vmem:[#allocation7 + $0x18] sm:$0xff]   ;;  %v411_v11 = vld [vmem:[#allocation5 + $0x30] sm:$0xff]   ;;  %p493_p11 = scmp.lt.s32.totalorder %s306_s8, %s306_s8 }
  0x3a   :  { %357 = vmatprep.subr.bf16.mxu0 %v521_v0  ;;  %377 = vmatprep.subr.bf16.mxu1 %v521_v0  ;;  %v418_v12 = vld [vmem:[#allocation7 + $0x20] sm:$0xff]   ;;  %v412_v13 = vld [vmem:[#allocation5 + $0x38] sm:$0xff]   ;;  %v419_v14 = vld [vmem:[#allocation7 + $0x28] sm:$0xff]  }
  0x3b   :  { %v413_v15 = vld [vmem:[#allocation2] sm:$0xff]   ;;  %v420_v16 = vld [vmem:[#allocation7 + $0x30] sm:$0xff]  }
  0x3c   :  { %v421_v17 = vld [vmem:[#allocation7 + $0x38] sm:$0xff]  }
  0x3d   :  { %358 = vmatpush3.bf16.msra.mxu0 %v406_v2  ;;  %378 = vmatpush3.bf16.msra.mxu1 %v415_v6  ;;  %v318_v18 = vld [vmem:[%s628_s2] ss:$0 sm:$0xff]  ;;  %s488_s2 = scalar_lea.vmem %s306_s8, 256 }
  0x3e   :  { %359 = vmatprep.subr.bf16.mxu0 %v521_v0  ;;  %379 = vmatprep.subr.bf16.mxu1 %v521_v0  ;;  %v328_v28 = vld [vmem:[%s630_s4] ss:$0 sm:$0xff]  ;;  %p489_p10 = scmp.ne.s32.totalorder %s306_s8, %s488_s2  ;;  %p494_p12 = scmp.lt.s32.totalorder %s488_s2, %s488_s2 }
  0x40   :  { %p495_p13 = por %p494_p12, %p493_p11 }
  0x41   :  { %360 = vmatpush3.bf16.msra.mxu0 %v407_v3  ;;  %380 = vmatpush3.bf16.msra.mxu1 %v416_v8 }
  0x42   :  { %361 = vmatprep.subr.bf16.mxu0 %v521_v0  ;;  %381 = vmatprep.subr.bf16.mxu1 %v521_v0  ;;  %p496_p0 = pnand %p495_p13, %p489_p10 }
  0x45   :  { %362 = vmatpush3.bf16.msra.mxu0 %v408_v5  ;;  %382 = vmatpush3.bf16.msra.mxu1 %v417_v10 }
  0x46   :  { %363 = vmatprep.subr.bf16.mxu0 %v521_v0  ;;  %383 = vmatprep.subr.bf16.mxu1 %v521_v0 }
  0x49   :  { %364 = vmatpush3.bf16.msra.mxu0 %v409_v7  ;;  %384 = vmatpush3.bf16.msra.mxu1 %v418_v12 }
  0x4a   :  { %365 = vmatprep.subr.bf16.mxu0 %v521_v0  ;;  %385 = vmatprep.subr.bf16.mxu1 %v521_v0 }
  0x4d   :  { %366 = vmatpush3.bf16.msra.mxu0 %v410_v9  ;;  %386 = vmatpush3.bf16.msra.mxu1 %v419_v14 }
  0x4e   :  { %367 = vmatprep.subr.bf16.mxu0 %v521_v0  ;;  %387 = vmatprep.subr.bf16.mxu1 %v521_v0 }
  0x51   :  { %368 = vmatpush3.bf16.msra.mxu0 %v411_v11  ;;  %388 = vmatpush3.bf16.msra.mxu1 %v420_v16 }
  0x52   :  { %369 = vmatprep.subr.bf16.mxu0 %v521_v0  ;;  %389 = vmatprep.subr.bf16.mxu1 %v521_v0 }
  0x55   :  { %370 = vmatpush3.bf16.msra.mxu0 %v412_v13  ;;  %390 = vmatpush3.bf16.msra.mxu1 %v421_v17 }
  0x58   :  { %372 = vmatmul.mubr.bf16.vlgmr.msra.gmra.mrb[0].mxu0 %v413_v15 }
 0x12b   :  { %v176_v19 = vpop.f32.mrb[0].mxu0 }
 0x12c   :  { %v177_v20 = vadd.f32 %v318_v18, %v176_v19  ;;  %v373_v21 = vpop.f32.mrb[1].mxu0 }
 0x12d   :  { %v179_v22 = vpop.f32.mrb[2].mxu0 }
 0x12e   :  { %v180_v23 = vadd.f32 %v318_v18, %v179_v22  ;;  %v374_v24 = vpop.f32.mrb[3].mxu0  ;;  %v183_v25 = vmax.f32 %v177_v20, 0.0 }
 0x130   :  { %v184_v26 = vmax.f32 %v180_v23, 0.0 }
 0x132   :  { %v185_v27 = vpack.c.bf16 %v184_v26, %v183_v25 }
 0x134   :  { %392 = vmatmul.mubr.bf16.vlgmr.msra.gmra.mrb[0].mxu1 %v185_v27 }
 0x207   :  { %v291_v29 = vpop.f32.mrb[0].mxu1 }
 0x208   :  { %v292_v30 = vadd.f32 %v328_v28, %v291_v29  ;;  %v393_v31 = vpop.f32.mrb[1].mxu1 }
 0x209   :  { %v294_v32 = vpop.f32.mrb[2].mxu1 }
 0x20a   :  { %298 = vst [vmem:[#allocation8] sm:$0xff] %v292_v30  ;;  %v295_v33 = vadd.f32 %v328_v28, %v294_v32  ;;  %v394_v34 = vpop.f32.mrb[3].mxu1 }
 0x20c   :  { %299 = vst [vmem:[#allocation8 + $0x8] sm:$0xff] %v295_v33 }
 0x20d   :  { %499 = shalt.err (!%p496_p0)
}
 0x20e   :  { %s500_s10 = scalar_lea.hbm %s631_s5, 256 }
 0x20f   :  { %p501_p1 = scmp.ne.s32.totalorder %s631_s5, %s500_s10  ;;  %p504_p2 = scmp.lt.u32.totalorder %s500_s10, %s631_s5 }
 0x211   :  { %p506_p3 = pnand %p504_p2, %p501_p1 }
 0x213   :  { %509 = shalt.err (!%p506_p3)
}
 0x214   :  { %s524_s15 = smov 128   ;;  %s525_s16 = smov 8  }
 0x215   :  { %311 = dma.vmem_to_hbm [thread:$0]  %s306_s8, 256, %s631_s5, [#allocation4], %s524_s15, %s524_s15, %s525_s16  }
 0x216   :  { %514 = dma.done.wait [#allocation4], 256  }
 0x217   :  { %515 = vsyncadd [#allocation4], 4294967040 }
 0x218   :  { %315 = vsyncpa [#allocation3], 1 }
 0x219   :  { %316 = vsyncpa [#allocation6], 1 }
 0x21a   :  { %317 = vsyncpa [#allocation4], 1 }

</bundles_post_ra>
